<compile_context>
chip_gen: v5e
topology: v5e:2x2
jax: 0.10.0
libtpu: 0.0.40
codegen_flags: <defaults>
</compile_context>

<pallas_src>
import jax
import jax.numpy as jnp
import numpy as np
from jax.experimental import pallas as pl
from jax.experimental.pallas import tpu as pltpu


def _round_up(x, m):
    return ((x + m - 1) // m) * m


# ----------------------------------------------------------------------------
# Pallas kernel: causal depthwise filtering + fused routing matmul + tree
# ----------------------------------------------------------------------------
def _make_hglm_kernel(TB, H, T_no, sub_no, children):
    """children[s] = static tuple of child subunit indices (C_den[s, c] == 1).

    TB = time tile (multiple of 128, lane axis).  H = halo width (multiple of
    128, >= T_no - 1).  main block covers spike times [b*TB, (b+1)*TB); halo
    block covers [b*TB - H, b*TB)."""

    def kernel(main_ref, halo_ref, kern_ref, csyn_ref, wv_ref, out_ref):
        # spikes arrive as bf16 (exact for 0/1); compute in f32 on the VPU
        main = main_ref[...].astype(jnp.float32)          # (C, TB)
        halo = halo_ref[...].astype(jnp.float32)          # (C, H)
        # column i of s_ext == spike time  b*TB - H + i
        s_ext = jnp.concatenate([halo, main], axis=1)     # (C, H + TB)
        k = kern_ref[...]                                 # (C, T_no), f32

        # ---- causal depthwise synaptic filtering (lane-dense, VPU) ----------
        # filt[:, t] = sum_j S[:, t - j] * k[:, j]  -> column H + t - j
        # TODO(synk): for large T_no switch this unrolled lag loop to
        # lax.fori_loop(..., unroll=4/8) to bound compile time / vreg pressure.
        filt = s_ext[:, H:H + TB] * k[:, 0:1]
        for j in range(1, T_no):
            off = H - j
            filt = filt + s_ext[:, off:off + TB] * k[:, j:j + 1]

        # ---- fused E+I synapse -> subunit routing (single MXU matmul) -------
        syn_in = jnp.dot(csyn_ref[...], filt,
                         preferred_element_type=jnp.float32)      # (sub_no, TB)

        # ---- dendritic-tree recursion, kept entirely in registers -----------
        wv = wv_ref[...]                                  # (1, sub_no + 1)
        sub_rows = [jnp.zeros((1, TB), jnp.float32)] * sub_no
        for s in range(sub_no - 1, -1, -1):               # same order as torch
            acc = syn_in[s:s + 1, :]
            for c in children[s]:                         # static tree
                acc = acc + wv[:, c:c + 1] * sub_rows[c]
            sub_rows[s] = jnp.tanh(acc)                   # EUP

        # final voltage = root * W_sub[0] + V_o, lane-dense (1, TB) store
        out_ref[...] = sub_rows[0] * wv[:, 0:1] + wv[:, sub_no:sub_no + 1]

    return kernel


# ----------------------------------------------------------------------------
# Plain-JAX glue (parameter -> per-synapse alpha kernels)
# ----------------------------------------------------------------------------
def build_syn_kernels(W_syn, Tau_syn, Delta_syn, syn_loc_e, syn_loc_i, T_no):
    t_raw = jnp.arange(T_no, dtype=jnp.float32)                   # (T_no,)
    delta = jnp.exp(Delta_syn)                                    # (kern_no, 2)
    tau = jnp.exp(Tau_syn)                                        # (kern_no, 2)
    t_s = t_raw[None, :, None] - delta[:, None, :]                # (k, T, 2)
    t_s = jnp.maximum(t_s, 0.0)
    tt = t_s / tau[:, None, :]
    alpha = tt * jnp.exp(-tt) * W_syn[:, None, :]                 # (k, T, 2)
    kern_e = alpha[syn_loc_e, :, 0]                               # (E_no, T_no)
    kern_i = alpha[syn_loc_i, :, 1]                               # (I_no, T_no)
    return kern_e, kern_i


def greedy_base_hglm_forward(S_e, S_i, params, C_den, syn_loc_e, syn_loc_i,
                             T_no, temp=1.0, test=True, key=None,
                             time_block=1024):
    S_e = S_e.astype(jnp.float32)
    S_i = S_i.astype(jnp.float32)
    T_data, E_no = S_e.shape
    I_no = S_i.shape[1]
    sub_no = C_den.shape[0]
    C = E_no + I_no

    # --- C_syn assignment matrices, (sub, syn), E and I fused -----------------
    if test:
        C_syn_e = jax.nn.one_hot(jnp.argmax(params["C_syn_e_logit"], axis=0),
                                 sub_no, dtype=jnp.float32).T      # (sub, E)
        C_syn_i = jax.nn.one_hot(jnp.argmax(params["C_syn_i_logit"], axis=0),
                                 sub_no, dtype=jnp.float32).T      # (sub, I)
    else:
        eps = 1e-8
        ke, ki = jax.random.split(key)
        u_e = jax.random.uniform(ke, params["C_syn_e_logit"].shape)
        u_i = jax.random.uniform(ki, params["C_syn_i_logit"].shape)
        g_e = -jnp.log(-jnp.log(u_e + eps) + eps)
        g_i = -jnp.log(-jnp.log(u_i + eps) + eps)
        C_syn_e = jax.nn.softmax((params["C_syn_e_logit"] + g_e) / temp, axis=0)
        C_syn_i = jax.nn.softmax((params["C_syn_i_logit"] + g_i) / temp, axis=0)
    csyn_all = jnp.concatenate([C_syn_e, C_syn_i], axis=1)         # (sub, C)

    kern_e, kern_i = build_syn_kernels(params["W_syn"], params["Tau_syn"],
                                       params["Delta_syn"],
                                       syn_loc_e, syn_loc_i, T_no)
    kern_all = jnp.concatenate([kern_e, kern_i], axis=0)           # (C, T_no)

    # --- static dendritic-tree structure (C_den is a fixed adjacency) ---------
    C_den_np = np.asarray(C_den)
    children = tuple(tuple(int(c) for c in np.nonzero(C_den_np[s] == 1)[0])
                     for s in range(sub_no))

    # --- time tiling: lane axis = time, TB multiple of 128 --------------------
    assert time_block % 128 == 0 and time_block >= 128
    TB = int(min(time_block, _round_up(T_data, 128)))
    H = _round_up(max(T_no - 1, 1), 128)          # halo width (>= T_no - 1)
    assert TB % H == 0, "time_block must be a multiple of the halo width"
    nb = (T_data + TB - 1) // TB
    total = nb * TB

    # padded [channel, time] spike slab in bf16 (spikes are 0/1 -> exact).
    # front pad of one full block (>= H) doubles as the zero halo for block 0.
    # TODO(synk): for very large synapse counts (E_no + I_no in the thousands)
    # add a second reduction grid axis over channel tiles to bound VMEM.
    S_ct = jnp.concatenate([S_e, S_i], axis=1).T.astype(jnp.bfloat16)  # (C, T)
    pad_full = jnp.zeros((C, TB + total), jnp.bfloat16)
    pad_full = pad_full.at[:, TB:TB + T_data].set(S_ct)

    # W_sub and V_o folded into one scalar parameter row for the kernel
    wv_row = jnp.concatenate(
        [params["W_sub"].reshape(sub_no).astype(jnp.float32),
         params["V_o"].reshape(1).astype(jnp.float32)]).reshape(1, sub_no + 1)

    kernel = _make_hglm_kernel(TB, H, T_no, sub_no, children)
    nhb = TB // H                                  # halo blocks per time block
    out2d = pl.pallas_call(
        kernel,
        out_shape=jax.ShapeDtypeStruct((1, total), jnp.float32),
        grid=(nb,),
        in_specs=[
            # main spikes: columns [TB + b*TB, TB + (b+1)*TB)
            pl.BlockSpec((C, TB), lambda b: (0, b + 1)),
            # halo spikes: columns [TB + b*TB - H, TB + b*TB)
            pl.BlockSpec((C, H), lambda b: (0, (b + 1) * nhb - 1)),
            pl.BlockSpec((C, T_no), lambda b: (0, 0)),        # alpha kernels
            pl.BlockSpec((sub_no, C), lambda b: (0, 0)),      # routing matrix
            pl.BlockSpec((1, sub_no + 1), lambda b: (0, 0)),  # W_sub ++ V_o
        ],
        out_specs=pl.BlockSpec((1, TB), lambda b: (0, b)),
        compiler_params=pltpu.CompilerParams(
            dimension_semantics=("parallel",)),
    )(pad_full, pad_full, kern_all, csyn_all, wv_row)

    return out2d[0, :T_data]


# ----------------------------------------------------------------------------
# Pure-JAX reference (mirrors the PyTorch forward, test=True branch)
# ----------------------------------------------------------------------------
def ref_forward(S_e, S_i, params, C_den, syn_loc_e, syn_loc_i, T_no):
    T_data, E_no = S_e.shape
    I_no = S_i.shape[1]
    sub_no = C_den.shape[0]
    C_syn_e = jax.nn.one_hot(jnp.argmax(params["C_syn_e_logit"], axis=0),
                             sub_no, axis=0, dtype=jnp.float32)   # (sub, E)
    C_syn_i = jax.nn.one_hot(jnp.argmax(params["C_syn_i_logit"], axis=0),
                             sub_no, axis=0, dtype=jnp.float32)   # (sub, I)
    kern_e, kern_i = build_syn_kernels(params["W_syn"], params["Tau_syn"],
                                       params["Delta_syn"],
                                       syn_loc_e, syn_loc_i, T_no)
    filt_e = jnp.stack([jnp.convolve(S_e[:, e], kern_e[e], mode="full")[:T_data]
                        for e in range(E_no)], axis=1)
    filt_i = jnp.stack([jnp.convolve(S_i[:, i], kern_i[i], mode="full")[:T_data]
                        for i in range(I_no)], axis=1)
    syn_in = filt_e @ C_syn_e.T + filt_i @ C_syn_i.T
    sub_out = jnp.zeros((T_data, sub_no), jnp.float32)
    for s in range(sub_no - 1, -1, -1):
        leaf_w = C_den[s].astype(jnp.float32) * params["W_sub"]
        nonlin_in = syn_in[:, s] + sub_out @ leaf_w
        sub_out = sub_out.at[:, s].set(jnp.tanh(nonlin_in))
    return sub_out[:, 0] * params["W_sub"][0] + params["V_o"][0]


if __name__ == "__main__":
    key = jax.random.PRNGKey(0)
    sub_no, E_no, I_no, T_no, kern_no, T_data = 4, 16, 16, 8, 3, 300

    # dendritic tree adjacency: C_den[parent, child] = 1 (children > parent)
    C_den = jnp.array([[0, 1, 1, 0],
                       [0, 0, 0, 1],
                       [0, 0, 0, 0],
                       [0, 0, 0, 0]], dtype=jnp.float32)

    keys = jax.random.split(key, 10)
    syn_loc_e = jax.random.randint(keys[0], (E_no,), 0, kern_no)
    syn_loc_i = jax.random.randint(keys[1], (I_no,), 0, kern_no)

    # deterministic synthetic parameters (shapes match the PyTorch __init__)
    params = {
        "W_syn": jax.random.normal(keys[2], (kern_no, 2)) * 0.1,
        "Tau_syn": jnp.ones((kern_no, 2), jnp.float32),
        "Delta_syn": jax.random.uniform(keys[3], (kern_no, 2)),
        "W_sub": jax.random.uniform(keys[4], (sub_no,)),
        "V_o": jax.random.normal(keys[5], (1,)),
        "Theta": jnp.zeros((sub_no,), jnp.float32),   # unused in forward
        "C_syn_e_logit": jax.random.normal(keys[6], (sub_no, E_no)),
        "C_syn_i_logit": jax.random.normal(keys[7], (sub_no, I_no)),
    }

    # sparse binary spike trains
    S_e = (jax.random.uniform(keys[8], (T_data, E_no)) < 0.2).astype(jnp.float32)
    S_i = (jax.random.uniform(keys[9], (T_data, I_no)) < 0.2).astype(jnp.float32)

    # time_block=128 so the test exercises multiple grid blocks and the
    # cross-block causal halo path.
    out = greedy_base_hglm_forward(S_e, S_i, params, C_den,
                                   syn_loc_e, syn_loc_i, T_no,
                                   temp=1.0, test=True, time_block=128)
    out = jax.block_until_ready(out)

    ref = ref_forward(S_e, S_i, params, C_den, syn_loc_e, syn_loc_i, T_no)
    np.testing.assert_allclose(np.asarray(out), np.asarray(ref),
                               rtol=1e-4, atol=1e-4)
    print("KERNEL_OK")
</pallas_src>

<mosaic_0001>
module attributes {stable_mosaic.version = 11 : i64} {
  func.func @kernel(%arg0: i32, %arg1: memref<32x128xbf16, #tpu.memory_space<vmem>>, %arg2: memref<32x128xbf16, #tpu.memory_space<vmem>>, %arg3: memref<32x8xf32, #tpu.memory_space<vmem>>, %arg4: memref<4x32xf32, #tpu.memory_space<vmem>>, %arg5: memref<1x5xf32, #tpu.memory_space<vmem>>, %arg6: memref<1x128xf32, #tpu.memory_space<vmem>>) attributes {dimension_semantics = [#tpu.dimension_semantics<parallel>], iteration_bounds = array<i64: 3>, scalar_prefetch = 0 : i64, scratch_operands = 0 : i64, tpu.core_type = #tpu.core_type<tc>, window_params = [{transform_indices = @transform_0, window_bounds = array<i64: 32, 128>}, {transform_indices = @transform_1, window_bounds = array<i64: 32, 128>}, {pipeline_mode = #tpu.pipeline_mode<synchronous>, transform_indices = @transform_2, window_bounds = array<i64: 32, 8>}, {pipeline_mode = #tpu.pipeline_mode<synchronous>, transform_indices = @transform_3, window_bounds = array<i64: 4, 32>}, {pipeline_mode = #tpu.pipeline_mode<synchronous>, transform_indices = @transform_4, window_bounds = array<i64: 1, 5>}, {transform_indices = @transform_5, window_bounds = array<i64: 1, 128>}]} {
    %c0 = arith.constant 0 : index
    %c0_0 = arith.constant 0 : index
    %0 = vector.load %arg1[%c0, %c0_0] : memref<32x128xbf16, #tpu.memory_space<vmem>>, vector<32x128xbf16>
    %1 = arith.extf %0 : vector<32x128xbf16> to vector<32x128xf32>
    %c0_1 = arith.constant 0 : index
    %c0_2 = arith.constant 0 : index
    %2 = vector.load %arg2[%c0_1, %c0_2] : memref<32x128xbf16, #tpu.memory_space<vmem>>, vector<32x128xbf16>
    %3 = arith.extf %2 : vector<32x128xbf16> to vector<32x128xf32>
    %4 = tpu.concatenate %3, %1 in 1 : vector<32x128xf32>, vector<32x128xf32> -> vector<32x256xf32>
    %c0_3 = arith.constant 0 : index
    %c0_4 = arith.constant 0 : index
    %5 = vector.load %arg3[%c0_3, %c0_4] : memref<32x8xf32, #tpu.memory_space<vmem>>, vector<32x8xf32>
    %6 = vector.extract_strided_slice %4 {offsets = [0, 128], sizes = [32, 128], strides = [1, 1]} : vector<32x256xf32> to vector<32x128xf32>
    %7 = vector.extract_strided_slice %5 {offsets = [0, 0], sizes = [32, 1], strides = [1, 1]} : vector<32x8xf32> to vector<32x1xf32>
    %8 = vector.broadcast %7 : vector<32x1xf32> to vector<32x128xf32>
    %9 = arith.mulf %6, %8 : vector<32x128xf32>
    %10 = vector.extract_strided_slice %4 {offsets = [0, 127], sizes = [32, 128], strides = [1, 1]} : vector<32x256xf32> to vector<32x128xf32>
    %11 = vector.extract_strided_slice %5 {offsets = [0, 1], sizes = [32, 1], strides = [1, 1]} : vector<32x8xf32> to vector<32x1xf32>
    %12 = vector.broadcast %11 : vector<32x1xf32> to vector<32x128xf32>
    %13 = arith.mulf %10, %12 : vector<32x128xf32>
    %14 = arith.addf %9, %13 : vector<32x128xf32>
    %15 = vector.extract_strided_slice %4 {offsets = [0, 126], sizes = [32, 128], strides = [1, 1]} : vector<32x256xf32> to vector<32x128xf32>
    %16 = vector.extract_strided_slice %5 {offsets = [0, 2], sizes = [32, 1], strides = [1, 1]} : vector<32x8xf32> to vector<32x1xf32>
    %17 = vector.broadcast %16 : vector<32x1xf32> to vector<32x128xf32>
    %18 = arith.mulf %15, %17 : vector<32x128xf32>
    %19 = arith.addf %14, %18 : vector<32x128xf32>
    %20 = vector.extract_strided_slice %4 {offsets = [0, 125], sizes = [32, 128], strides = [1, 1]} : vector<32x256xf32> to vector<32x128xf32>
    %21 = vector.extract_strided_slice %5 {offsets = [0, 3], sizes = [32, 1], strides = [1, 1]} : vector<32x8xf32> to vector<32x1xf32>
    %22 = vector.broadcast %21 : vector<32x1xf32> to vector<32x128xf32>
    %23 = arith.mulf %20, %22 : vector<32x128xf32>
    %24 = arith.addf %19, %23 : vector<32x128xf32>
    %25 = vector.extract_strided_slice %4 {offsets = [0, 124], sizes = [32, 128], strides = [1, 1]} : vector<32x256xf32> to vector<32x128xf32>
    %26 = vector.extract_strided_slice %5 {offsets = [0, 4], sizes = [32, 1], strides = [1, 1]} : vector<32x8xf32> to vector<32x1xf32>
    %27 = vector.broadcast %26 : vector<32x1xf32> to vector<32x128xf32>
    %28 = arith.mulf %25, %27 : vector<32x128xf32>
    %29 = arith.addf %24, %28 : vector<32x128xf32>
    %30 = vector.extract_strided_slice %4 {offsets = [0, 123], sizes = [32, 128], strides = [1, 1]} : vector<32x256xf32> to vector<32x128xf32>
    %31 = vector.extract_strided_slice %5 {offsets = [0, 5], sizes = [32, 1], strides = [1, 1]} : vector<32x8xf32> to vector<32x1xf32>
    %32 = vector.broadcast %31 : vector<32x1xf32> to vector<32x128xf32>
    %33 = arith.mulf %30, %32 : vector<32x128xf32>
    %34 = arith.addf %29, %33 : vector<32x128xf32>
    %35 = vector.extract_strided_slice %4 {offsets = [0, 122], sizes = [32, 128], strides = [1, 1]} : vector<32x256xf32> to vector<32x128xf32>
    %36 = vector.extract_strided_slice %5 {offsets = [0, 6], sizes = [32, 1], strides = [1, 1]} : vector<32x8xf32> to vector<32x1xf32>
    %37 = vector.broadcast %36 : vector<32x1xf32> to vector<32x128xf32>
    %38 = arith.mulf %35, %37 : vector<32x128xf32>
    %39 = arith.addf %34, %38 : vector<32x128xf32>
    %40 = vector.extract_strided_slice %4 {offsets = [0, 121], sizes = [32, 128], strides = [1, 1]} : vector<32x256xf32> to vector<32x128xf32>
    %41 = vector.extract_strided_slice %5 {offsets = [0, 7], sizes = [32, 1], strides = [1, 1]} : vector<32x8xf32> to vector<32x1xf32>
    %42 = vector.broadcast %41 : vector<32x1xf32> to vector<32x128xf32>
    %43 = arith.mulf %40, %42 : vector<32x128xf32>
    %44 = arith.addf %39, %43 : vector<32x128xf32>
    %c0_5 = arith.constant 0 : index
    %c0_6 = arith.constant 0 : index
    %45 = vector.load %arg4[%c0_5, %c0_6] : memref<4x32xf32, #tpu.memory_space<vmem>>, vector<4x32xf32>
    %cst = arith.constant dense<0.000000e+00> : vector<4x128xf32>
    %46 = tpu.matmul %45, %44, %cst {dimension_numbers = #tpu.dot_dimension_numbers<[1], [0], [0], [1], [0, 0, 1, 1], [], []>} : vector<4x32xf32>, vector<32x128xf32>, vector<4x128xf32> -> vector<4x128xf32>
    %c0_7 = arith.constant 0 : index
    %c0_8 = arith.constant 0 : index
    %47 = vector.load %arg5[%c0_7, %c0_8] : memref<1x5xf32, #tpu.memory_space<vmem>>, vector<1x5xf32>
    %48 = vector.extract_strided_slice %46 {offsets = [3, 0], sizes = [1, 128], strides = [1, 1]} : vector<4x128xf32> to vector<1x128xf32>
    %49 = math.tanh %48 : vector<1x128xf32>
    %50 = vector.extract_strided_slice %46 {offsets = [2, 0], sizes = [1, 128], strides = [1, 1]} : vector<4x128xf32> to vector<1x128xf32>
    %51 = math.tanh %50 : vector<1x128xf32>
    %52 = vector.extract_strided_slice %46 {offsets = [1, 0], sizes = [1, 128], strides = [1, 1]} : vector<4x128xf32> to vector<1x128xf32>
    %53 = vector.extract_strided_slice %47 {offsets = [0, 3], sizes = [1, 1], strides = [1, 1]} : vector<1x5xf32> to vector<1x1xf32>
    %54 = vector.broadcast %53 : vector<1x1xf32> to vector<1x128xf32>
    %55 = arith.mulf %54, %49 : vector<1x128xf32>
    %56 = arith.addf %52, %55 : vector<1x128xf32>
    %57 = math.tanh %56 : vector<1x128xf32>
    %58 = vector.extract_strided_slice %46 {offsets = [0, 0], sizes = [1, 128], strides = [1, 1]} : vector<4x128xf32> to vector<1x128xf32>
    %59 = vector.extract_strided_slice %47 {offsets = [0, 1], sizes = [1, 1], strides = [1, 1]} : vector<1x5xf32> to vector<1x1xf32>
    %60 = vector.broadcast %59 : vector<1x1xf32> to vector<1x128xf32>
    %61 = arith.mulf %60, %57 : vector<1x128xf32>
    %62 = arith.addf %58, %61 : vector<1x128xf32>
    %63 = vector.extract_strided_slice %47 {offsets = [0, 2], sizes = [1, 1], strides = [1, 1]} : vector<1x5xf32> to vector<1x1xf32>
    %64 = vector.broadcast %63 : vector<1x1xf32> to vector<1x128xf32>
    %65 = arith.mulf %64, %51 : vector<1x128xf32>
    %66 = arith.addf %62, %65 : vector<1x128xf32>
    %67 = math.tanh %66 : vector<1x128xf32>
    %68 = vector.extract_strided_slice %47 {offsets = [0, 0], sizes = [1, 1], strides = [1, 1]} : vector<1x5xf32> to vector<1x1xf32>
    %69 = vector.broadcast %68 : vector<1x1xf32> to vector<1x128xf32>
    %70 = arith.mulf %67, %69 : vector<1x128xf32>
    %71 = vector.extract_strided_slice %47 {offsets = [0, 4], sizes = [1, 1], strides = [1, 1]} : vector<1x5xf32> to vector<1x1xf32>
    %72 = vector.broadcast %71 : vector<1x1xf32> to vector<1x128xf32>
    %73 = arith.addf %70, %72 : vector<1x128xf32>
    %c0_9 = arith.constant 0 : index
    %c0_10 = arith.constant 0 : index
    %74 = vector.load %arg6[%c0_9, %c0_10] : memref<1x128xf32, #tpu.memory_space<vmem>>, vector<1x128xf32>
    tpu.vector_store %arg6[%c0_9, %c0_10], %73 {strides = array<i32>} : memref<1x128xf32, #tpu.memory_space<vmem>>, vector<1x128xf32>,
    return
  }
  func.func @transform_0(%arg0: i32) -> (i32, i32) {
    %c1_i32 = arith.constant 1 : i32
    %0 = arith.addi %arg0, %c1_i32 : i32
    %c0_i32 = arith.constant 0 : i32
    %c0_i32_0 = arith.constant 0 : i32
    return %c0_i32, %0 : i32, i32
  }
  func.func @transform_1(%arg0: i32) -> (i32, i32) {
    %c1_i32 = arith.constant 1 : i32
    %0 = arith.addi %arg0, %c1_i32 : i32
    %c1_i32_0 = arith.constant 1 : i32
    %1 = arith.muli %0, %c1_i32_0 : i32
    %c1_i32_1 = arith.constant 1 : i32
    %2 = arith.subi %1, %c1_i32_1 : i32
    %c0_i32 = arith.constant 0 : i32
    %c0_i32_2 = arith.constant 0 : i32
    return %c0_i32, %2 : i32, i32
  }
  func.func @transform_2(%arg0: i32) -> (i32, i32) {
    %c0_i32 = arith.constant 0 : i32
    %c0_i32_0 = arith.constant 0 : i32
    %c0_i32_1 = arith.constant 0 : i32
    return %c0_i32, %c0_i32_0 : i32, i32
  }
  func.func @transform_3(%arg0: i32) -> (i32, i32) {
    %c0_i32 = arith.constant 0 : i32
    %c0_i32_0 = arith.constant 0 : i32
    %c0_i32_1 = arith.constant 0 : i32
    return %c0_i32, %c0_i32_0 : i32, i32
  }
  func.func @transform_4(%arg0: i32) -> (i32, i32) {
    %c0_i32 = arith.constant 0 : i32
    %c0_i32_0 = arith.constant 0 : i32
    %c0_i32_1 = arith.constant 0 : i32
    return %c0_i32, %c0_i32_0 : i32, i32
  }
  func.func @transform_5(%arg0: i32) -> (i32, i32) {
    %c0_i32 = arith.constant 0 : i32
    %c0_i32_0 = arith.constant 0 : i32
    return %c0_i32, %arg0 : i32, i32
  }
}

</mosaic_0001>

<bundles_post_ra>
// kernel: tpu_custom_call.1
= control target key start
LH: loop header
LB: loop body
LE: loop exit
PB: predicated region body
PF: predicated region fallthrough
CT: control target
= control target key end

     0   :  { %s1795_s0 = inlined_call_operand.hbm [shape: bf16[32,512], index: 0, kind: input, shape index: {}]   ;;  %s1796_s1 = inlined_call_operand.hbm [shape: bf16[32,512], index: 1, kind: input, shape index: {}]   ;;  %s1797_s2 = inlined_call_operand.vmem [shape: f32[32,8], index: 2, kind: input, shape index: {}]   ;;  %s1798_s3 = inlined_call_operand.vmem [shape: f32[4,32], index: 3, kind: input, shape index: {}]   ;;  %s1799_s4 = inlined_call_operand.vmem [shape: f32[1,5], index: 4, kind: input, shape index: {}]   ;;  %s1800_s5 = inlined_call_operand.hbm [shape: f32[1,384], index: 5, kind: output, shape index: {}]  }
   0x1   :  { %1805 = sst [smem:[#allocation14_spill]] %s1795_s0 }
   0x2   :  { %10 = vsyncpa [#allocation3], 0 }
   0x3   :  { %12 = vsyncpa [#allocation3 + $0x1], 0 }
   0x4   :  { %13 = vsyncpa [#allocation6], 0 }
   0x5   :  { %15 = vsyncpa [#allocation6 + $0x1], 0 }
   0x6   :  { %16 = vsyncpa [#allocation4], 0 }
   0x7   :  { %18 = vsyncpa [#allocation4 + $0x1], 0  ;;  %s1292_s18 = smov 0   ;;  %s1294_s19 = smov 0  }
   0x8   :  { %s1296_s20 = smov 0   ;;  %s1298_s21 = smov 0  }
   0x9   :  { %s1300_s22 = smov 0   ;;  %s1302_s23 = smov 0  }
   0xa   :  { %s1304_s24 = smov 0  }
   0xb LB: > { %1806 = sst [smem:[#allocation11_spill]] %s1238_s23  ;;  %s1326_s25 = sadd.s32 4294967295, %s1242_s24   ;;  %s1242_s24 = sphi %s1304_s24, %s1829_s24   ;;  %s1238_s23 = sphi %s1302_s23, %s1823_s23   ;;  %s1234_s22 = sphi %s1300_s22, %s1828_s22   ;;  %s1230_s21 = sphi %s1298_s21, %s1827_s21   ;;  %s1226_s20 = sphi %s1296_s20, %s1826_s20   ;;  %s1222_s19 = sphi %s1294_s19, %s1825_s19   ;;  %s1218_s18 = sphi %s1292_s18, %s1824_s18  }
   0xc   : > { %s1329_s26 = sadd.s32 1, %s1242_s24   ;;  %s33_s28 = sadd.s32 1, %s1238_s23 }
   0xd   : > { %s29_s27 = sadd.s32 1, %s1329_s26  ;;  %p40_p0 = scmp.ne.s32.totalorder %s1238_s23, %s1234_s22 }
   0xe   : > { %s30_s29 = ssub.s32 %s1329_s26, %s29_s27  ;;  %p41_p2 = scmp.eq.s32.totalorder %s1242_s24, 0 }
   0xf   : > { %p31_p1 = scmp.eq.s32.totalorder %s30_s29, 0  ;;  %p46_p3 = scmp.ne.s32.totalorder %s1234_s22, %s1230_s21 }
  0x10   : > { %p47_p4 = scmp.eq.s32.totalorder %s1326_s25, 0  ;;  %p1344_p5 = por %p41_p2, %p40_p0 }
  0x11   : > { %s1340_s30 = scalar_select %p31_p1, %s1238_s23, %s33_s28  }
  0x12   : > { %p1350_p6 = por %p47_p4, %p46_p3  ;;  %p983_p7 = scmp.lt.s32.totalorder %s1242_s24, 3 }
  0x13   : > { %1807 = sst [smem:[#allocation12_spill]] %s1340_s30  ;;  %s194_s8 = sand.u32 1, %s1238_s23  }
  0x14   : > { %s939_s9 = sshll.u32 %s1242_s24, 2  ;;  %s938_s10 = sshll.u32 %s194_s8, 4 }
  0x15   : > { %s1810_s0 = sld [smem:[#allocation14_spill]]  ;;  %s198_s15 = scalar_lea.vmem [#allocation2], %s938_s10 }
  0x16   : > { %s206_s16 = sshll.u32 %s198_s15, 4  ;;  %p1366_p8 = pnand %p983_p7, %p1344_p5  ;;  %s207_s16 = int_to_ptr.vmem [resolvable:$true] %s206_s16 }
  0x17   : > { %s195_s27 = scalar_lea.sflag [#allocation3], %s194_s8 }
  0x18   : > { %p1092_p10 = pneg %p1366_p8 }
  0x1b   : > { %s876_s13 = scalar_lea.hbm %s1810_s0, %s939_s9  ;;  %s1095_s12 = scalar_lea.hbm %s1810_s0, 64 }
  0x1c   : > { %s877_s14 = scalar_lea.hbm %s876_s13, 4 }
  0x1d   : > { %s204_s17 = sshll.u32 %s877_s14, 4  ;;  %s205_s17 = int_to_ptr.hbm [resolvable:$true] %s204_s17 }
  0x1e   : > { %s1088_s28 = sshra.s32 %s205_s17, 4  ;;  %s1089_s28 = int_to_ptr.hbm [resolvable:$true] %s1088_s28 }
  0x1f   : > { %s1090_s29 = scalar_lea.hbm %s1089_s28, 16  ;;  %p1096_p13 = scmp.lt.s32.totalorder %s1089_s28, %s1810_s0 }
  0x20   : > { %p1091_p9 = scmp.ne.s32.totalorder %s1089_s28, %s1090_s29  ;;  %p1097_p0 = scmp.lt.s32.totalorder %s1095_s12, %s1090_s29 }
  0x22   : > { %p1093_p11 = pnand %p1092_p10, %p1091_p9  ;;  %p1098_p1 = por %p1097_p0, %p1096_p13 }
  0x24   : > { %p1094_p12 = pneg %p1093_p11 }
  0x26   : > { %p1099_p3 = pnand %p1098_p1, %p1094_p12 }
  0x28   : > { %1102 = shalt.err (!%p1099_p3)
}
  0x29   : > { %s1801_s8 = smov 256   ;;  %s1802_s14 = smov 64  }
  0x2a   : > { %s1803_s15 = smov 4   ;;  %p942_p5 = scmp.ge.s32.totalorder %s1242_s24, 1 }
  0x2b   : > { %975 = dma.hbm_to_vmem [thread:$0]  (!%p1366_p8), %s205_s17, 256, %s207_s16, %s195_s27, %s1801_s8, %s1802_s14, %s1803_s15  }
  0x2c   : > { %p235_p9 = scmp.lt.s32.totalorder %s1242_s24, 4  ;;  %s935_s29 = sadd.s32 4294967294, %s1242_s24  }
  0x2d   : > { %s56_s10 = ssub.s32 %s1242_s24, %s1329_s26  ;;  %s59_s11 = sadd.s32 1, %s1226_s20 }
  0x2e   : > { %p1385_p10 = pnand %p942_p5, %p235_p9  ;;  %p57_p11 = scmp.eq.s32.totalorder %s56_s10, 0 }
  0x2f   : > { %p66_p12 = scmp.ne.s32.totalorder %s1226_s20, %s1222_s19  ;;  %p72_p13 = scmp.ne.s32.totalorder %s1222_s19, %s1218_s18 }
  0x30   : > { %p159_p0 = scmp.eq.s32.totalorder %s1326_s25, 2  ;;  %p165_p5 = scmp.eq.s32.totalorder %s935_s29, 2 }
  0x31   : > { %s1399_s21 = scalar_select %p57_p11, %s1226_s20, %s59_s11  }
  0x32   : > { %p68_p8 = por %p66_p12, %p41_p2  ;;  %p1405_p1 = por %p72_p13, %p47_p4 }
  0x33   : > { %1813 = sst [smem:[#allocation13_spill]] %s1399_s21  ;;  %p1409_p3 = por %p159_p0, %p66_p12 }
  0x34   : > { %s216_s27 = sand.u32 1, %s1226_s20   ;;  %s224_s13 = scalar_lea.hbm %s1796_s1, %s939_s9 }
  0x35   : > { %p1419_p9 = por %p165_p5, %p72_p13  ;;  %s940_s11 = sshll.u32 %s216_s27, 4 }
  0x36   : > { %s225_s8 = sshll.u32 %s224_s13, 4  ;;  %s220_s14 = scalar_lea.vmem [#allocation5], %s940_s11  ;;  %s226_s8 = int_to_ptr.hbm [resolvable:$true] %s225_s8 }
  0x37   : > { %s227_s15 = sshll.u32 %s220_s14, 4  ;;  %p1425_p2 = pnand %p983_p7, %p68_p8  ;;  %s228_s15 = int_to_ptr.vmem [resolvable:$true] %s227_s15 }
  0x38   : > { %s217_s29 = scalar_lea.sflag [#allocation6], %s216_s27  ;;  %s1118_s30 = sshra.s32 %s226_s8, 4  ;;  %s1119_s30 = int_to_ptr.hbm [resolvable:$true] %s1118_s30 }
  0x39   : > { %s1120_s9 = scalar_lea.hbm %s1119_s30, 16  ;;  %p1122_p11 = pneg %p1425_p2 }
  0x3a   : > { %p1121_p4 = scmp.ne.s32.totalorder %s1119_s30, %s1120_s9  ;;  %s1125_s14 = scalar_lea.hbm %s1796_s1, 64 }
  0x3b   : > { %p1126_p7 = scmp.lt.s32.totalorder %s1119_s30, %s1796_s1  ;;  %p1127_p0 = scmp.lt.s32.totalorder %s1125_s14, %s1120_s9 }
  0x3c   : > { %p1123_p12 = pnand %p1122_p11, %p1121_p4 }
  0x3d   : > { %p1128_p8 = por %p1127_p0, %p1126_p7 }
  0x3e   : > { %p1124_p13 = pneg %p1123_p12 }
  0x40   : > { %p1129_p5 = pnand %p1128_p8, %p1124_p13 }
  0x42   : > { %1132 = shalt.err (!%p1129_p5)
}
  0x43   : > { %s1818_s27 = smov 4   ;;  %s1819_s23 = smov 64  }
  0x44   : > { %s1820_s21 = smov 256   ;;  %239 = sbr.rel (%p1385_p10) target bundleno = 719 (0x2cf), region = 40 }
  0x45   : > { %978 = dma.hbm_to_vmem [thread:$0]  (!%p1425_p2), %s226_s8, 256, %s228_s15, %s217_s29, %s1820_s21, %s1819_s23, %s1818_s27  }
  0x46   : > { %s241_s12 = sand.u32 (!%p1385_p10), 1, %s1234_s22  }
  0x47   : > { %s1445_s6 = sshll.u32 (!%p1385_p10), %s241_s12, 4  ;;  %s242_s30 = scalar_lea.sflag (!%p1385_p10), [#allocation3], %s241_s12 }
  0x48   : > { %s245_s9 = scalar_lea.vmem (!%p1385_p10), [#allocation2], %s1445_s6 }
  0x49   : > { %1205 = dma.done.wait (%p1350_p6), %s242_s30, 256  }
  0x4a   : > { %1207 = vsyncadd (%p1350_p6), %s242_s30, 4294967040  ;;  %s1453_s0 = sand.u32 1, %s1222_s19  }
  0x4b   : > { %s944_s23 = sshll.u32 %s1453_s0, 4  ;;  %s252_s8 = scalar_lea.sflag [#allocation6], %s1453_s0 }
  0x4c   : > { %s1457_s15 = scalar_lea.vmem [#allocation5], %s944_s23 }
  0x4d   : > { %1209 = dma.done.wait (%p1405_p1), %s252_s8, 256  }
  0x4e   : > { %1211 = vsyncadd (%p1405_p1), %s252_s8, 4294967040  ;;  %v1247_v0 = vmov 1   ;;  %v1248_v1 = vmov 0   ;;  %v1469_v2 = vld [vmem:[%s1797_s2 + $0x10] sm:$0xff]  ;;  %v1474_v3 = vld [vmem:[%s1797_s2] sm:$0xff]  ;;  %v1249_v6 = vmov 2   ;;  %s841_s14 = scalar_lea.hbm %s1800_s5, %s1326_s25 }
  0x4f   : > { %1061 = vset.pattern.permute.xlu2 %v1247_v0  ;;  %1060 = vset.pattern.permute.xlu1 %v1248_v1  ;;  %v307_v4 = vld [vmem:[%s1797_s2 + $0x18] sm:$0xff]  ;;  %v1485_v5 = vld [vmem:[%s1797_s2 + $0x8] sm:$0xff]  ;;  %v1250_v7 = vmov 3   ;;  %v1251_v8 = vmov 4   ;;  %v1252_v9 = vmov 5   ;;  %v1253_v10 = vmov 7  }
  0x50   : > { %1059 = vset.pattern.permute.xlu0 %v1248_v1  ;;  %320 = vperm.xlu1 %1060, %v1469_v2   ;;  %v1254_v11 = vmov 6   ;;  %v949_v12 = vld [vmem:[%s245_s9] sm:$0xff]   ;;  %s1255_s27 = smov 1   ;;  %v964_v28 = vld [vmem:[%s245_s9 + $0x8] sm:$0xff]   ;;  %s1256_s12 = smov 2   ;;  %vm380_vm0 = vcmask 7168  }
  0x51   : > { %333 = vperm.xlu2 %1061, %v1474_v3   ;;  %310 = vperm.xlu0 %1059, %v1474_v3   ;;  %v957_v13 = vld [vmem:[%s1457_s15] sm:$0xff]   ;;  %v1516_v14 = vunpack.c.l.bf16 %v949_v12  ;;  %v1524_v19 = vunpack.c.h.bf16 %v949_v12  ;;  %v1538_v29 = vunpack.c.h.bf16 %v964_v28  ;;  %v965_v33 = vld [vmem:[%s1457_s15 + $0x8] sm:$0xff]   ;;  %v1552_v37 = vunpack.c.l.bf16 %v964_v28  ;;  %s1257_s6 = smov 3   ;;  %s1258_s30 = smov 4  }
  0x52   : > { %v1518_v15 = vunpack.c.l.bf16 %v957_v13  ;;  %v1526_v20 = vunpack.c.h.bf16 %v957_v13  ;;  %v1548_v35 = vunpack.c.h.bf16 %v965_v33  ;;  %v1550_v36 = vunpack.c.l.bf16 %v965_v33  ;;  %s1259_s9 = smov 5   ;;  %s1260_s23 = smov 7  }
  0x53   : > { %vm441_vm1 = vcmask 15360   ;;  %vm502_vm2 = vcmask 23552   ;;  %s1261_s8 = smov 6   ;;  %vm563_vm3 = vcmask 31744   ;;  %vm624_vm4 = vcmask 39936   ;;  %s286_s13 = scalar_lea.vmem [#allocation7], %s1453_s0 }
  0x54   : > { %vm685_vm5 = vcmask 48128   ;;  %vm746_vm6 = vcmask 56320   ;;  %vm760_vm7 = vcmask 261120   ;;  %s843_s11 = sshll.u32 %s286_s13, 4  ;;  %s844_s11 = int_to_ptr.vmem [resolvable:$true] %s843_s11 }
  0x58   : > { %325 = vperm.xlu1 %1060, %v307_v4  }
  0x59   : > { %337 = vperm.xlu2 %1061, %v1485_v5   ;;  %315 = vperm.xlu0 %1059, %v1485_v5  }
  0x60   : > { %1063 = vset.pattern.permute.xlu1 %v1247_v0 }
  0x61   : > { %1064 = vset.pattern.permute.xlu2 %v1249_v6  ;;  %1062 = vset.pattern.permute.xlu0 %v1247_v0 }
  0x62   : > { %345 = vperm.xlu1 %1063, %v307_v4   ;;  %341 = vperm.xlu0 %1062, %v1469_v2  }
  0x63   : > { %394 = vperm.xlu2 %1064, %v1474_v3  }
  0x6a   : > { %1066 = vset.pattern.permute.xlu1 %v1249_v6  ;;  %1065 = vset.pattern.permute.xlu0 %v1249_v6 }
  0x6b   : > { %402 = vperm.xlu1 %1066, %v1469_v2   ;;  %398 = vperm.xlu0 %1065, %v1485_v5  }
  0x6c   : > { %406 = vperm.xlu2 %1064, %v307_v4  }
  0x73   : > { %1067 = vset.pattern.permute.xlu1 %v1250_v7  ;;  %1070 = vset.pattern.permute.xlu0 %v1251_v8 }
  0x74   : > { %467 = vperm.xlu1 %1067, %v307_v4   ;;  %1068 = vset.pattern.permute.xlu2 %v1250_v7 }
  0x75   : > { %463 = vperm.xlu2 %1068, %v1469_v2   ;;  %524 = vperm.xlu0 %1070, %v1469_v2  }
  0x7c   : > { %1069 = vset.pattern.permute.xlu1 %v1251_v8 }
  0x7d   : > { %528 = vperm.xlu1 %1069, %v307_v4   ;;  %459 = vperm.xlu2 %1068, %v1485_v5  }
  0x7e   : > { %516 = vperm.xlu0 %1070, %v1474_v3  }
  0x85   : > { %1071 = vset.pattern.permute.xlu1 %v1252_v9  ;;  %1072 = vset.pattern.permute.xlu2 %v1251_v8 }
  0x86   : > { %589 = vperm.xlu1 %1071, %v307_v4   ;;  %520 = vperm.xlu2 %1072, %v1485_v5  }
  0x87   : > { %1074 = vset.pattern.permute.xlu0 %v1253_v10 }
  0x88   : > { %711 = vperm.xlu0 %1074, %v307_v4  }
  0x8e   : > { %585 = vperm.xlu1 %1071, %v1469_v2   ;;  %1073 = vset.pattern.permute.xlu2 %v1254_v11 }
  0x8f   : > { %650 = vperm.xlu2 %1073, %v307_v4  }
  0x96   : > { %581 = vperm.xlu1 %1071, %v1485_v5  }
  0x97   : > { %646 = vperm.xlu2 %1073, %v1469_v2  }
  0x9e   : > { %577 = vperm.xlu1 %1071, %v1474_v3  }
  0x9f   : > { %642 = vperm.xlu2 %1073, %v1485_v5  }
  0xa6   : > { %1075 = vset.pattern.permute.xlu1 %v1253_v10 }
  0xab   : > { %v334_v16 = vpop.permute.xlu2 %333 }
  0xac   : > { %v348_v17 = vmul.f32 %v1518_v15, %v334_v16  ;;  %v349_v18 = vmul.f32 %v1516_v14, %v334_v16 }
  0xae   : > { %366 = vrot.lane.b32.xlu1 %v349_v18, %s1255_s27  ;;  %364 = vrot.lane.b32.xlu2 %v348_v17, %s1255_s27 }
  0xb3   : > { %v338_v21 = vpop.permute.xlu2 %337 }
  0xb4   : > { %v350_v22 = vmul.f32 %v1526_v20, %v338_v21  ;;  %v351_v23 = vmul.f32 %v1524_v19, %v338_v21 }
  0xb6   : > { %370 = vrot.lane.b32.xlu0 %v351_v23, %s1255_s27  ;;  %368 = vrot.lane.b32.xlu2 %v350_v22, %s1255_s27 }
  0xbd   : > { %v395_v24 = vpop.permute.xlu2 %394 }
  0xbe   : > { %v410_v44 = vmul.f32 %v1516_v14, %v395_v24  ;;  %v409_v50 = vmul.f32 %v1518_v15, %v395_v24 }
  0xc2   : > { %v1532_v25 = vpop.permute.xlu1 %320 }
  0xc3   : > { %v1534_v26 = vpop.permute.xlu0 %310 }
  0xc6   : > { %v407_v27 = vpop.permute.xlu2 %406 }
  0xc7   : > { %v416_v57 = vmul.f32 %v1538_v29, %v407_v27  ;;  %v415_v61 = vmul.f32 %v1548_v35, %v407_v27  ;;  %v328_v27 = vmul.f32 %v1516_v14, %v1534_v26 }
  0xca   : > { %v326_v30 = vpop.permute.xlu1 %325 }
  0xcb   : > { %v1541_v31 = vmul.f32 %v1538_v29, %v326_v30  ;;  %v1543_v32 = vpop.permute.xlu0 %315 }
  0xcf   : > { %v1546_v34 = vpop.permute.xlu2 %463 }
  0xd0   : > { %v475_v11 = vmul.f32 %v1552_v37, %v1546_v34 }
  0xd4   : > { %v346_v38 = vpop.permute.xlu1 %345  ;;  %v342_v39 = vpop.permute.xlu0 %341 }
  0xd5   : > { %v354_v40 = vmul.f32 %v1548_v35, %v346_v38  ;;  %v352_v41 = vmul.f32 %v1550_v36, %v342_v39  ;;  %v353_v42 = vmul.f32 %v1552_v37, %v342_v39  ;;  %v355_v45 = vmul.f32 %v1538_v29, %v346_v38 }
  0xd6   : > { %v329_v38 = vmul.f32 %v1524_v19, %v1543_v32 }
  0xd7   : > { %376 = vrot.lane.b32.xlu0 %v354_v40, %s1255_s27  ;;  %v460_v43 = vpop.permute.xlu2 %459  ;;  %374 = vrot.lane.b32.xlu2 %v353_v42, %s1255_s27 }
  0xd8   : > { %372 = vrot.lane.b32.xlu1 %v352_v41, %s1255_s27  ;;  %v472_v13 = vmul.f32 %v1526_v20, %v460_v43  ;;  %v473_v17 = vmul.f32 %v1524_v19, %v460_v43 }
  0xdd   : > { %v399_v46 = vpop.permute.xlu0 %398  ;;  %v403_v47 = vpop.permute.xlu1 %402 }
  0xde   : > { %v411_v48 = vmul.f32 %v1526_v20, %v399_v46  ;;  %v413_v51 = vmul.f32 %v1550_v36, %v403_v47  ;;  %v414_v52 = vmul.f32 %v1552_v37, %v403_v47  ;;  %v412_v58 = vmul.f32 %v1524_v19, %v399_v46 }
  0xdf   : > { %427 = vrot.lane.b32.xlu2 %v410_v44, %s1256_s12  ;;  %v330_v46 = vmul.f32 %v1552_v37, %v1532_v25 }
  0xe0   : > { %378 = vrot.lane.b32.xlu1 %v355_v45, %s1255_s27  ;;  %v1564_v49 = vpop.permute.xlu2 %520  ;;  %429 = vrot.lane.b32.xlu0 %v411_v48, %s1256_s12  ;;  %s845_s27 = sshll.u32 %s841_s14, 4  ;;  %s846_s27 = int_to_ptr.hbm [resolvable:$true] %s845_s27 }
  0xe1   : > { %v533_v26 = vmul.f32 %v1526_v20, %v1564_v49 }
  0xe6   : > { %v468_v53 = vpop.permute.xlu1 %467 }
  0xe7   : > { %433 = vrot.lane.b32.xlu2 %v413_v51, %s1256_s12  ;;  %v525_v60 = vpop.permute.xlu0 %524  ;;  %v476_v4 = vmul.f32 %v1548_v35, %v468_v53  ;;  %v477_v9 = vmul.f32 %v1538_v29, %v468_v53 }
  0xe8   : > { %425 = vrot.lane.b32.xlu1 %v409_v50, %s1256_s12  ;;  %435 = vrot.lane.b32.xlu0 %v414_v52, %s1256_s12  ;;  %v536_v18 = vmul.f32 %v1552_v37, %v525_v60 }
  0xe9   : > { %v651_v54 = vpop.permute.xlu2 %650 }
  0xea   : > { %v1570_v55 = vmul.f32 %v1548_v35, %v651_v54  ;;  %v1573_v56 = vmul.f32 %v1538_v29, %v651_v54 }
  0xef   : > { %v529_v59 = vpop.permute.xlu1 %528  ;;  %439 = vrot.lane.b32.xlu2 %v416_v57, %s1256_s12 }
  0xf0   : > { %431 = vrot.lane.b32.xlu1 %v412_v58, %s1256_s12  ;;  %703 = vperm.xlu0 %1074, %v1485_v5   ;;  %v1580_v63 = vpop.permute.xlu0 %516  ;;  %v537_v12 = vmul.f32 %v1548_v35, %v529_v59 }
  0xf7   : > { %638 = vperm.xlu2 %1073, %v1474_v3  }
  0xf8   : > { %437 = vrot.lane.b32.xlu1 %v415_v61, %s1256_s12  ;;  %v590_v62 = vpop.permute.xlu1 %589  ;;  %1076 = vset.pattern.permute.xlu0 %v1250_v7  ;;  %s833_s12 = scalar_lea.sflag [#allocation4], %s1453_s0 }
  0xf9   : > { %455 = vperm.xlu0 %1076, %v1474_v3   ;;  %v598_v22 = vmul.f32 %v1548_v35, %v590_v62 }
  0xfa   : > { %v712_v5 = vpop.permute.xlu0 %711 }
  0xfb   : > { %v1593_v7 = vmul.f32 %v1538_v29, %v712_v5  ;;  %v720_v52 = vmul.f32 %v1548_v35, %v712_v5 }
  0xff   : > { %498 = vrot.lane.b32.xlu2 %v476_v4, %s1257_s6 }
 0x100   : > { %707 = vperm.xlu1 %1075, %v1469_v2   ;;  %1078 = vset.pattern.permute.xlu2 %v1249_v6  ;;  %v1590_v10 = vpop.permute.xlu1 %585  ;;  %v1601_v2 = vpop.permute.xlu2 %646  ;;  %v474_v6 = vmul.f32 %v1550_v36, %v1546_v34  ;;  %v599_v34 = vmul.f32 %v1538_v29, %v590_v62 }
 0x101   : > { %500 = vrot.lane.b32.xlu0 %v477_v9, %s1257_s6  ;;  %v597_v43 = vmul.f32 %v1552_v37, %v1590_v10 }
 0x107   : > { %496 = vrot.lane.b32.xlu2 %v475_v11, %s1257_s6 }
 0x108   : > { %699 = vperm.xlu1 %1075, %v1474_v3   ;;  %v1606_v16 = vpop.permute.xlu1 %581  ;;  %v538_v3 = vmul.f32 %v1538_v29, %v529_v59  ;;  %v1615_v21 = vpop.permute.xlu2 %642  ;;  %v531_v29 = vmul.f32 %v1518_v15, %v1580_v63 }
 0x109   : > { %559 = vrot.lane.b32.xlu0 %v537_v12, %s1258_s30  ;;  %v595_v44 = vmul.f32 %v1524_v19, %v1606_v16 }
 0x10f   : > { %490 = vrot.lane.b32.xlu2 %v472_v13, %s1257_s6 }
 0x110   : > { %494 = vrot.lane.b32.xlu1 %v474_v6, %s1257_s6  ;;  %v1618_v23 = vpop.permute.xlu1 %577  ;;  %v365_v24 = vpop.permute.xlu2 %364 }
 0x111   : > { %1077 = vset.pattern.permute.xlu1 %v1247_v0  ;;  %492 = vrot.lane.b32.xlu0 %v473_v17, %s1257_s6  ;;  %v535_v0 = vmul.f32 %v1550_v36, %v525_v60  ;;  %v593_v59 = vmul.f32 %v1516_v14, %v1618_v23 }
 0x117   : > { %557 = vrot.lane.b32.xlu2 %v536_v18, %s1258_s30 }
 0x118   : > { %561 = vrot.lane.b32.xlu1 %v538_v3, %s1258_s30  ;;  %v369_v39 = vpop.permute.xlu2 %368 }
 0x119   : > { %620 = vrot.lane.b32.xlu0 %v598_v22, %s1259_s9 }
 0x120   : > { %555 = vrot.lane.b32.xlu1 %v535_v0, %s1258_s30  ;;  %v367_v28 = vpop.permute.xlu1 %366 }
 0x121   : > { %v381_v30 = vsel %vm380_vm0, %v365_v24, %v367_v28 }
 0x122   : > { %v389_v33 = vadd.f32 %v381_v30, %v328_v27 }
 0x128   : > { %622 = vrot.lane.b32.xlu1 %v599_v34, %s1259_s9  ;;  %v371_v40 = vpop.permute.xlu0 %370  ;;  %v534_v34 = vmul.f32 %v1524_v19, %v1564_v49 }
 0x129   : > { %v382_v41 = vsel %vm380_vm0, %v369_v39, %v371_v40 }
 0x12a   : > { %v390_v42 = vadd.f32 %v382_v41, %v329_v38  ;;  %v596_v38 = vmul.f32 %v1550_v36, %v1590_v10 }
 0x130   : > { %551 = vrot.lane.b32.xlu1 %v533_v26, %s1258_s30 }
 0x131   : > { %v375_v32 = vpop.permute.xlu2 %374 }
 0x138   : > { %618 = vrot.lane.b32.xlu1 %v597_v43, %s1259_s9 }
 0x139   : > { %v428_v50 = vpop.permute.xlu2 %427 }
 0x140   : > { %547 = vrot.lane.b32.xlu1 %v531_v29, %s1258_s30 }
 0x141   : > { %v434_v25 = vpop.permute.xlu2 %433 }
 0x148   : > { %614 = vrot.lane.b32.xlu1 %v595_v44, %s1259_s9 }
 0x149   : > { %v377_v45 = vpop.permute.xlu0 %376  ;;  %v440_v5 = vpop.permute.xlu2 %439 }
 0x14a   : > { %v373_v47 = vpop.permute.xlu1 %372 }
 0x14b   : > { %v383_v48 = vsel %vm380_vm0, %v373_v47, %v375_v32  ;;  %v532_v47 = vmul.f32 %v1516_v14, %v1580_v63  ;;  %v784_v63 = vld [vmem:[%s1799_s4] sm:$0x1] }
 0x14c   : > { %v391_v51 = vadd.f32 %v383_v48, %v330_v46  ;;  %v594_v46 = vmul.f32 %v1526_v20, %v1606_v16  ;;  %v657_v48 = vmul.f32 %v1550_v36, %v1601_v2  ;;  %v592_v16 = vmul.f32 %v1518_v15, %v1618_v23 }
 0x150   : > { %742 = vrot.lane.b32.xlu1 %v720_v52, %s1260_s23 }
 0x151   : > { %v639_v13 = vpop.permute.xlu2 %638 }
 0x152   : > { %v379_v53 = vpop.permute.xlu1 %378  ;;  %v430_v57 = vpop.permute.xlu0 %429  ;;  %v654_v26 = vmul.f32 %v1516_v14, %v639_v13  ;;  %v653_v23 = vmul.f32 %v1518_v15, %v639_v13 }
 0x153   : > { %v384_v54 = vsel %vm380_vm0, %v377_v45, %v379_v53 }
 0x154   : > { %v392_v58 = vadd.f32 %v384_v54, %v1541_v31 }
 0x158   : > { %610 = vrot.lane.b32.xlu1 %v593_v59, %s1259_s9 }
 0x159   : > { %v499_v27 = vpop.permute.xlu2 %498 }
 0x15a   : > { %v426_v60 = vpop.permute.xlu1 %425  ;;  %v436_v62 = vpop.permute.xlu0 %435 }
 0x15b   : > { %v442_v61 = vsel %vm441_vm1, %v426_v60, %v428_v50  ;;  %v444_v4 = vsel %vm441_vm1, %v434_v25, %v436_v62  ;;  %v658_v50 = vmul.f32 %v1552_v37, %v1601_v2  ;;  %v656_v2 = vmul.f32 %v1524_v19, %v1615_v21 }
 0x15c   : > { %v1655_v35 = vadd.f32 %v442_v61, %v389_v33  ;;  %v452_v9 = vadd.f32 %v444_v4, %v391_v51 }
 0x161   : > { %v497_v41 = vpop.permute.xlu2 %496 }
 0x162   : > { %v432_v11 = vpop.permute.xlu1 %431  ;;  %v1657_v6 = vpop.permute.xlu0 %703 }
 0x163   : > { %v443_v12 = vsel %vm441_vm1, %v430_v57, %v432_v11  ;;  %v717_v52 = vmul.f32 %v1524_v19, %v1657_v6 }
 0x164   : > { %v451_v31 = vadd.f32 %v443_v12, %v390_v42 }
 0x169   : > { %v491_v32 = vpop.permute.xlu2 %490 }
 0x16a   : > { %v438_v17 = vpop.permute.xlu1 %437 }
 0x16b   : > { %v445_v3 = vsel %vm441_vm1, %v438_v17, %v440_v5  ;;  %v456_v22 = vpop.permute.xlu0 %455 }
 0x16c   : > { %v453_v18 = vadd.f32 %v445_v3, %v392_v58  ;;  %v470_v0 = vmul.f32 %v1518_v15, %v456_v22  ;;  %v471_v24 = vmul.f32 %v1516_v14, %v456_v22 }
 0x16e   : > { %488 = vrot.lane.b32.xlu0 %v471_v24, %s1257_s6  ;;  %486 = vrot.lane.b32.xlu2 %v470_v0, %s1257_s6  ;;  %s1162_s6 = sshra.s32 %s846_s27, 4  ;;  %s1163_s6 = int_to_ptr.hbm [resolvable:$true] %s1162_s6 }
 0x16f   : > { %p1169_p2 = scmp.lt.s32.totalorder %s1163_s6, %s1800_s5 }
 0x171   : > { %v558_v53 = vpop.permute.xlu2 %557 }
 0x172   : > { %v708_v28 = vpop.permute.xlu1 %707 }
 0x173   : > { %v718_v30 = vmul.f32 %v1550_v36, %v708_v28  ;;  %v501_v33 = vpop.permute.xlu0 %500  ;;  %v655_v36 = vmul.f32 %v1526_v20, %v1615_v21  ;;  %v719_v51 = vmul.f32 %v1552_v37, %v708_v28 }
 0x174   : > { %v506_v39 = vsel %vm502_vm2, %v499_v27, %v501_v33 }
 0x175   : > { %738 = vrot.lane.b32.xlu1 %v718_v30, %s1260_s23  ;;  %v1670_v40 = vadd.f32 %v506_v39, %v453_v18 }
 0x176   : > { %616 = vrot.lane.b32.xlu0 %v596_v38, %s1259_s9  ;;  %553 = vrot.lane.b32.xlu2 %v534_v34, %s1258_s30 }
 0x17a   : > { %v700_v42 = vpop.permute.xlu1 %699 }
 0x17b   : > { %v1675_v43 = vpop.permute.xlu0 %559  ;;  %v714_v49 = vmul.f32 %v1518_v15, %v700_v42  ;;  %v715_v15 = vmul.f32 %v1516_v14, %v700_v42 }
 0x17d   : > { %671 = vrot.lane.b32.xlu1 %v654_v26, %s1261_s8 }
 0x17e   : > { %683 = vrot.lane.b32.xlu0 %v1573_v56, %s1261_s8  ;;  %681 = vrot.lane.b32.xlu2 %v1570_v55, %s1261_s8 }
 0x182   : > { %v495_v10 = vpop.permute.xlu1 %494 }
 0x183   : > { %v505_v29 = vsel %vm502_vm2, %v495_v10, %v497_v41  ;;  %v493_v45 = vpop.permute.xlu0 %492 }
 0x184   : > { %v1684_v44 = vadd.f32 %v505_v29, %v452_v9  ;;  %v504_v56 = vsel %vm502_vm2, %v491_v32, %v493_v45 }
 0x185   : > { %730 = vrot.lane.b32.xlu1 %v714_v49, %s1260_s23  ;;  %v512_v55 = vadd.f32 %v504_v56, %v451_v31 }
 0x186   : > { %612 = vrot.lane.b32.xlu0 %v594_v46, %s1259_s9  ;;  %549 = vrot.lane.b32.xlu2 %v532_v47, %s1258_s30  ;;  %s1164_s30 = scalar_lea.hbm %s1163_s6, 1 }
 0x187   : > { %p1165_p6 = scmp.ne.s32.totalorder %s1163_s6, %s1164_s30 }
 0x189   : > { %p1166_p10 = pnand %p1165_p6, %p1409_p3 }
 0x18b   : > { %v621_v14 = vpop.permute.xlu0 %620  ;;  %p1167_p1 = pneg %p1166_p10 }
 0x18d   : > { %799 = vperm.xlu1 %1077, %v784_v63  }
 0x18e   : > { %679 = vrot.lane.b32.xlu0 %v658_v50, %s1261_s8  ;;  %677 = vrot.lane.b32.xlu2 %v657_v48, %s1261_s8 }
 0x195   : > { %1079 = vset.pattern.permute.xlu1 %v1248_v1  ;;  %v562_v1 = vpop.permute.xlu1 %561 }
 0x196   : > { %608 = vrot.lane.b32.xlu0 %v592_v16, %s1259_s9  ;;  %744 = vrot.lane.b32.xlu2 %v1593_v7, %s1260_s23  ;;  %v716_v7 = vmul.f32 %v1526_v20, %v1657_v6  ;;  %v567_v12 = vsel %vm563_vm3, %v1675_v43, %v562_v1 }
 0x197   : > { %820 = vperm.xlu1 %1079, %v784_v63   ;;  %v575_v31 = vadd.f32 %v567_v12, %v1670_v40 }
 0x19d   : > { %v556_v21 = vpop.permute.xlu1 %555 }
 0x19e   : > { %675 = vrot.lane.b32.xlu0 %v656_v2, %s1261_s8  ;;  %673 = vrot.lane.b32.xlu2 %v655_v36, %s1261_s8  ;;  %v566_v33 = vsel %vm563_vm3, %v556_v21, %v558_v53  ;;  %v759_v53 = vld [vmem:[%s1798_s3] sm:$0xf] }
 0x19f   : > { %v574_v38 = vadd.f32 %v566_v33, %v1684_v44 }
 0x1a5   : > { %v623_v37 = vpop.permute.xlu1 %622 }
 0x1a6   : > { %669 = vrot.lane.b32.xlu0 %v653_v23, %s1261_s8  ;;  %740 = vrot.lane.b32.xlu2 %v719_v51, %s1260_s23  ;;  %v628_v6 = vsel %vm624_vm4, %v621_v14, %v623_v37 }
 0x1a7   : > { %v636_v17 = vadd.f32 %v628_v6, %v575_v31 }
 0x1ad   : > { %v552_v20 = vpop.permute.xlu1 %551 }
 0x1ae   : > { %736 = vrot.lane.b32.xlu0 %v717_v52, %s1260_s23  ;;  %734 = vrot.lane.b32.xlu2 %v716_v7, %s1260_s23 }
 0x1b5   : > { %v619_v57 = vpop.permute.xlu1 %618 }
 0x1b6   : > { %788 = vperm.xlu0 %1076, %v784_v63   ;;  %732 = vrot.lane.b32.xlu2 %v715_v15, %s1260_s23  ;;  %s1168_s23 = scalar_lea.hbm %s1800_s5, 3 }
 0x1b7   : > { %p1170_p4 = scmp.lt.s32.totalorder %s1168_s23, %s1164_s30 }
 0x1b9   : > { %p1171_p11 = por %p1170_p4, %p1169_p2 }
 0x1bb   : > { %p1172_p12 = pnand %p1171_p11, %p1167_p1 }
 0x1bd   : > { %v548_v60 = vpop.permute.xlu1 %547 }
 0x1be   : > { %809 = vperm.xlu2 %1078, %v784_v63   ;;  %1081 = vset.pattern.permute.xlu0 %v1251_v8 }
 0x1c5   : > { %v615_v5 = vpop.permute.xlu1 %614 }
 0x1c6   : > { %1080 = vset.pattern.permute.xlu2 %v1251_v8 }
 0x1c7   : > { %826 = vperm.xlu2 %1080, %v784_v63  }
 0x1c8   : > { %v487_v19 = vpop.permute.xlu2 %486 }
 0x1cd   : > { %v743_v13 = vpop.permute.xlu1 %742 }
 0x1d0   : > { %v554_v54 = vpop.permute.xlu2 %553 }
 0x1d1   : > { %v565_v58 = vsel %vm563_vm3, %v552_v20, %v554_v54 }
 0x1d2   : > { %v573_v59 = vadd.f32 %v565_v58, %v512_v55 }
 0x1d5   : > { %v611_v30 = vpop.permute.xlu1 %610 }
 0x1d8   : > { %v682_v25 = vpop.permute.xlu2 %681 }
 0x1e0   : > { %v489_v61 = vpop.permute.xlu0 %488  ;;  %v550_v62 = vpop.permute.xlu2 %549 }
 0x1e1   : > { %v503_v4 = vsel %vm502_vm2, %v487_v19, %v489_v61  ;;  %v564_v56 = vsel %vm563_vm3, %v548_v60, %v550_v62 }
 0x1e2   : > { %v511_v9 = vadd.f32 %v503_v4, %v1655_v35 }
 0x1e4   : > { %v572_v48 = vadd.f32 %v564_v56, %v511_v9 }
 0x1e7   : > { %v739_v26 = vpop.permute.xlu1 %738 }
 0x1e8   : > { %v617_v8 = vpop.permute.xlu0 %616  ;;  %v678_v11 = vpop.permute.xlu2 %677 }
 0x1e9   : > { %v627_v34 = vsel %vm624_vm4, %v617_v8, %v619_v57 }
 0x1ea   : > { %v635_v39 = vadd.f32 %v627_v34, %v574_v38 }
 0x1ef   : > { %v672_v46 = vpop.permute.xlu1 %671 }
 0x1f0   : > { %v684_v3 = vpop.permute.xlu0 %683  ;;  %v745_v18 = vpop.permute.xlu2 %744 }
 0x1f1   : > { %v689_v22 = vsel %vm685_vm5, %v682_v25, %v684_v3  ;;  %v750_v0 = vsel %vm746_vm6, %v743_v13, %v745_v18 }
 0x1f2   : > { %v697_v35 = vadd.f32 %v689_v22, %v636_v17 }
 0x1f4   : > { %v758_v24 = vadd.f32 %v750_v0, %v697_v35 }
 0x1f6   : > { %776 = vmatpush.msra.mxu0 %v758_v24 }
 0x1f7   : > { %v731_v2 = vpop.permute.xlu1 %730 }
 0x1f8   : > { %v613_v27 = vpop.permute.xlu0 %612  ;;  %v674_v28 = vpop.permute.xlu2 %673 }
 0x1f9   : > { %v626_v44 = vsel %vm624_vm4, %v613_v27, %v615_v5 }
 0x1fa   : > { %v634_v16 = vadd.f32 %v626_v44, %v573_v59 }
 0x1ff   : > { %v800_v60 = vpop.permute.xlu1 %799 }
 0x200   : > { %v680_v40 = vpop.permute.xlu0 %679  ;;  %v741_v41 = vpop.permute.xlu2 %740  ;;  %v802_v62 = vperm.slane %v800_v60, 0 }
 0x201   : > { %v688_v42 = vsel %vm685_vm5, %v678_v11, %v680_v40  ;;  %v749_v49 = vsel %vm746_vm6, %v739_v26, %v741_v41 }
 0x202   : > { %v696_v43 = vadd.f32 %v688_v42, %v635_v39 }
 0x204   : > { %v757_v10 = vadd.f32 %v749_v49, %v696_v43 }
 0x206   : > { %777 = vmatpush.msra.mxu0 %v757_v10 }
 0x208   : > { %v609_v29 = vpop.permute.xlu0 %608  ;;  %v735_v45 = vpop.permute.xlu2 %734 }
 0x209   : > { %v625_v55 = vsel %vm624_vm4, %v609_v29, %v611_v30  ;;  %v821_v31 = vpop.permute.xlu1 %820 }
 0x20a   : > { %v633_v36 = vadd.f32 %v625_v55, %v572_v48  ;;  %v823_v17 = vperm.slane %v821_v31, 0 }
 0x210   : > { %v676_v32 = vpop.permute.xlu0 %675  ;;  %v733_v51 = vpop.permute.xlu2 %732 }
 0x211   : > { %v687_v50 = vsel %vm685_vm5, %v674_v28, %v676_v32  ;;  %v747_v15 = vsel %vm746_vm6, %v731_v2, %v733_v51 }
 0x212   : > { %v695_v23 = vadd.f32 %v687_v50, %v634_v16 }
 0x218   : > { %v670_v47 = vpop.permute.xlu0 %669  ;;  %v810_v25 = vpop.permute.xlu2 %809 }
 0x219   : > { %v686_v63 = vsel %vm685_vm5, %v670_v47, %v672_v46  ;;  %v812_v61 = vperm.slane %v810_v25, 0 }
 0x21a   : > { %v694_v1 = vadd.f32 %v686_v63, %v633_v36 }
 0x21c   : > { %v755_v37 = vadd.f32 %v747_v15, %v694_v1 }
 0x220   : > { %v737_v7 = vpop.permute.xlu0 %736 }
 0x221   : > { %v748_v52 = vsel %vm746_vm6, %v735_v45, %v737_v7  ;;  %v827_v13 = vpop.permute.xlu2 %826 }
 0x222   : > { %v756_v21 = vadd.f32 %v748_v52, %v695_v23  ;;  %v829_v3 = vperm.slane %v827_v13, 0 }
 0x224   : > { %778 = vmatpush.msra.mxu0 %v756_v21 }
 0x226   : > { %779 = vmatpush.msra.mxu0 %v755_v37 }
 0x227   : > { %945 = vmatmul.msk.f32.vlgmr.msra.gmra.mxu0 %vm760_vm7, %v759_v53 }
 0x228   : > { %v789_v19 = vpop.permute.xlu0 %788 }
 0x229   : > { %v791_v54 = vperm.slane %v789_v19, 0 }
 0x2a4   : > { %v781_v20 = vpop.f32.mrf.mxu0 }
 0x2a5   : > { %1082 = vtanh.f32 %v781_v20 }
 0x2ab   : > { %v1083_v57 = vpop.eup %1082 }
 0x2ac   : > { %v792_v58 = vmul.f32 %v1083_v57, %v791_v54  ;;  %v813_v9 = vmul.f32 %v1083_v57, %v812_v61 }
 0x2ae   : > { %v794_v59 = vrot.slane %v792_v58, 2  ;;  %v815_v11 = vrot.slane %v813_v9, 2 }
 0x2b0   : > { %v796_v14 = vadd.f32 %v794_v59, %v781_v20 }
 0x2b2   : > { %1084 = vtanh.f32 %v796_v14 }
 0x2b8   : > { %v1085_v4 = vpop.eup %1084 }
 0x2b9   : > { %v803_v5 = vmul.f32 %v1085_v4, %v802_v62 }
 0x2bb   : > { %v805_v8 = vrot.slane %v803_v5, 1 }
 0x2bd   : > { %v807_v12 = vadd.f32 %v805_v8, %v781_v20 }
 0x2bf   : > { %v817_v6 = vadd.f32 %v815_v11, %v807_v12 }
 0x2c1   : > { %1086 = vtanh.f32 %v817_v6 }
 0x2c7   : > { %v1087_v18 = vpop.eup %1086 }
 0x2c8   : > { %v824_v22 = vmul.f32 %v1087_v18, %v823_v17 }
 0x2ca   : > { %v830_v35 = vadd.f32 %v829_v3, %v824_v22 }
 0x2cc   : > { %831 = vst [vmem:[%s286_s13] sm:$0x1] %v830_v35 }
 0x2cd   : > { %1175 = shalt.err (!%p1172_p12)
}
 0x2ce   : > { %970 = dma.vmem_to_hbm [thread:$0]  (%p1409_p3), %s844_s11, 16, %s846_s27, %s833_s12  }
 0x2cf PF: > { %p984_p13 = scmp.ge.s32.totalorder %s1242_s24, 2  ;;  %s857_s0 = sand.u32 1, %s1218_s18  }
 0x2d0   : > { %s858_s7 = scalar_lea.sflag [#allocation4], %s857_s0 }
 0x2d1   : > { %p980_p7 = pnand %p984_p13, %p1419_p9 }
 0x2d3   : > { %p981_p0 = pneg %p980_p7 }
 0x2d5   : > { %1213 = dma.done.wait (%p981_p0), %s858_s7, 16  }
 0x2d6   : > { %1215 = vsyncadd (%p981_p0), %s858_s7, 4294967280  ;;  %s1821_s28 = sld [smem:[#allocation13_spill]]  ;;  %p21_p3 = scmp.ge.s32.totalorder %s1329_s26, 5  }
 0x2d7   : > { %s1822_s29 = sld [smem:[#allocation11_spill]]  ;;  %s1824_s18 = smov %s1222_s19 }
 0x2d8   : > { %s1823_s23 = sld [smem:[#allocation12_spill]]  ;;  %s1825_s19 = smov %s1226_s20 }
 0x2d9   : > { %s1827_s21 = smov %s1234_s22  ;;  %s1829_s24 = smov %s1329_s26 }
 0x2da   :  { %23 = sbr.rel (!%p21_p3) target bundleno = 11 (0xb), region = 98 }
 0x2dc   : > { %s1826_s20 = smov %s1821_s28 }
 0x2dd   : > { %s1828_s22 = smov %s1822_s29 }
 0x2df   :  { %863 = vsyncpa [#allocation3], 1 }
 0x2e0   :  { %865 = vsyncpa [#allocation3 + $0x1], 1 }
 0x2e1   :  { %866 = vsyncpa [#allocation6], 1 }
 0x2e2   :  { %868 = vsyncpa [#allocation6 + $0x1], 1 }
 0x2e3   :  { %869 = vsyncpa [#allocation4], 1 }
 0x2e4   :  { %871 = vsyncpa [#allocation4 + $0x1], 1 }

</bundles_post_ra>
